<compile_context>
chip_gen: v6e
topology: v6e:2x2x1
jax: 0.10.0
libtpu: 0.0.40
codegen_flags: <defaults>
</compile_context>

<pallas_src>
import functools
import math

import jax
import jax.numpy as jnp
from jax.experimental import pallas as pl
from jax.experimental.pallas import tpu as pltpu


# ----------------------------------------------------------------------------
# Generation-aware VMEM budget
# ----------------------------------------------------------------------------
def _physical_vmem_bytes():
    try:
        info_fn = getattr(pltpu, "get_tpu_info", None)
        if info_fn is not None:
            v = getattr(info_fn(), "vmem_capacity_bytes", None)
            if v:
                return int(v)
    except Exception:
        pass
    return 64 * 1024 * 1024  # conservative (v7x-sized) fallback


_VMEM_CAP = max(_physical_vmem_bytes() - 16 * 1024 * 1024, 32 * 1024 * 1024)


def _vmem_limit(est_bytes):
    return int(min(_VMEM_CAP, max(16 * 1024 * 1024, est_bytes)))


_CONV_ROW_TILE = 1024  # pixel rows per 1x1-conv matmul block


# ----------------------------------------------------------------------------
# Kernel 1: 1x1 conv == per-pixel matmul + bias (bf16 MXU, f32 accumulate)
# ----------------------------------------------------------------------------
def _conv1x1_kernel(x_ref, w_ref, b_ref, o_ref):
    acc = jnp.dot(x_ref[...], w_ref[...], preferred_element_type=jnp.float32)
    o_ref[...] = (acc + b_ref[...]).astype(o_ref.dtype)


def conv1x1(x_nchw, w_bf16, b_f32):
    """1x1 conv: NCHW f32 input -> NHWC bf16 output.

    bf16 operands on the MXU, f32 accumulation + bias, bf16 store (halves the
    dominant HBM write and the fuse kernel's re-read).  The NCHW->NHWC relayout
    fuses with the f32->bf16 cast under jit.
    Cin is left unpadded on the lane axis (review: pad only if profiling shows
    masked vld mattering; the conv is HBM-bound).
    """
    B, Cin, H, W = x_nchw.shape
    D = w_bf16.shape[1]
    M = B * H * W
    x2d = jnp.transpose(x_nchw, (0, 2, 3, 1)).astype(jnp.bfloat16).reshape(M, Cin)

    TM = min(_CONV_ROW_TILE, M)
    Mp = pl.cdiv(M, TM) * TM
    if Mp != M:
        x2d = jnp.pad(x2d, ((0, Mp - M), (0, 0)))

    est = (3 * TM * Cin * 2 + 2 * Cin * D * 2 + 2 * D * 4
           + 3 * TM * D * 2 + TM * D * 4)
    out2d = pl.pallas_call(
        _conv1x1_kernel,
        out_shape=jax.ShapeDtypeStruct((Mp, D), jnp.bfloat16),
        grid=(Mp // TM,),
        in_specs=[
            pl.BlockSpec((TM, Cin), lambda i: (i, 0)),   # pixel-row tile
            pl.BlockSpec((Cin, D), lambda i: (0, 0)),    # weights resident
            pl.BlockSpec((1, D), lambda i: (0, 0)),      # bias resident
        ],
        out_specs=pl.BlockSpec((TM, D), lambda i: (i, 0)),
        compiler_params=pltpu.CompilerParams(
            dimension_semantics=("parallel",),
            vmem_limit_bytes=_vmem_limit(est),
        ),
    )(x2d, w_bf16, b_f32.reshape(1, D))
    if Mp != M:
        out2d = out2d[:M]
    return out2d.reshape(B, H, W, D)


# ----------------------------------------------------------------------------
# Kernel 2: fused  lateral + 2x bilinear upsample(prev)  (align_corners=False)
# Dense output written directly via the free (B, Hs, 2, Ws, 2*D) view of NHWC.
# ----------------------------------------------------------------------------
def _upfuse_kernel(prev_ref, lat_ref, o_ref, *, th, Hs, avg):
    """One (batch, H-tile) step of: out = lateral + up2(prev) [optionally * 0.5].

    prev_ref : (Hs, Ws, D)      full coarse plane, resident across the H axis
    lat_ref  : (th, 2, Ws, 2D)  lateral rows [2*h*th, 2*(h+1)*th) in the
                                row-pair / column-pair-in-lanes view
    o_ref    : (th, 2, Ws, 2D)  fused output, same view (byte-identical NHWC)
    """
    h = pl.program_id(1)
    start = h * th

    p = prev_ref[pl.ds(start, th)].astype(jnp.float32)                      # (th, Ws, D)
    row_m = prev_ref[pl.ds(jnp.maximum(start - 1, 0), 1)].astype(jnp.float32)
    row_p = prev_ref[pl.ds(jnp.minimum(start + th, Hs - 1), 1)].astype(jnp.float32)

    # Half-pixel-center bilinear (edge clamped):
    #   dense[2k]   = 0.25*x[k-1] + 0.75*x[k]
    #   dense[2k+1] = 0.75*x[k]   + 0.25*x[k+1]
    p_hm = jnp.concatenate([row_m, p[:-1]], axis=0)
    p_hp = jnp.concatenate([p[1:], row_p], axis=0)
    r_e = 0.25 * p_hm + 0.75 * p        # even dense rows of this tile
    r_o = 0.75 * p + 0.25 * p_hp        # odd dense rows

    scale = 0.5 if avg else 1.0

    def w_up(r):
        # W direction; (th, Ws, D) -> (th, Ws, 2D) = [even-col chans | odd-col chans],
        # which is exactly the dense NHWC byte order with the column pair on lanes.
        r_wm = jnp.concatenate([r[:, :1], r[:, :-1]], axis=1)
        r_wp = jnp.concatenate([r[:, 1:], r[:, -1:]], axis=1)
        we = 0.25 * r_wm + 0.75 * r
        wo = 0.75 * r + 0.25 * r_wp
        return jnp.concatenate([we, wo], axis=-1)

    for hp, r in ((0, r_e), (1, r_o)):
        fused = lat_ref[:, hp].astype(jnp.float32) + w_up(r)
        o_ref[:, hp] = (fused * scale).astype(o_ref.dtype)


def _pick_fuse_h_tile(Hs, Ws, D, target_tile_bytes=2 * 1024 * 1024):
    # one coarse row -> 2 dense rows * 2Ws cols * D chans (bf16) of output
    per_row = 2 * Ws * 2 * D * 2
    max_th = max(1, target_tile_bytes // max(1, per_row))
    if max_th >= Hs:
        return Hs
    divs = [d for d in range(2, max_th + 1) if Hs % d == 0]
    return max(divs) if divs else Hs


def topdown_fuse(prev_nhwc, lat_nhwc, *, avg):
    """lateral + 2x bilinear upsample(prev) (optionally averaged).  NHWC in/out."""
    B, Hs, Ws, D = prev_nhwc.shape
    assert lat_nhwc.shape == (B, 2 * Hs, 2 * Ws, D)
    th = _pick_fuse_h_tile(Hs, Ws, D)
    out_dtype = lat_nhwc.dtype

    # Free (bitcast) view: dense NHWC (B, 2Hs, 2Ws, D) == (B, Hs, 2, Ws, 2D).
    lat5 = lat_nhwc.reshape(B, Hs, 2, Ws, 2 * D)

    prev_bytes = Hs * Ws * D * prev_nhwc.dtype.itemsize
    tile_bytes = th * 2 * Ws * 2 * D * out_dtype.itemsize
    temp_bytes = 12 * th * Ws * D * 4                       # f32 in-kernel temporaries
    est = 2 * prev_bytes + 4 * tile_bytes + temp_bytes + 4 * 1024 * 1024

    out5 = pl.pallas_call(
        functools.partial(_upfuse_kernel, th=th, Hs=Hs, avg=avg),
        out_shape=jax.ShapeDtypeStruct((B, Hs, 2, Ws, 2 * D), out_dtype),
        grid=(B, Hs // th),
        in_specs=[
            pl.BlockSpec((None, Hs, Ws, D), lambda b, h: (b, 0, 0, 0)),          # resident
            pl.BlockSpec((None, th, 2, Ws, 2 * D), lambda b, h: (b, h, 0, 0, 0)),
        ],
        out_specs=pl.BlockSpec((None, th, 2, Ws, 2 * D), lambda b, h: (b, h, 0, 0, 0)),
        compiler_params=pltpu.CompilerParams(
            dimension_semantics=("parallel", "parallel"),
            vmem_limit_bytes=_vmem_limit(est),
        ),
    )(prev_nhwc, lat5)
    return out5.reshape(B, 2 * Hs, 2 * Ws, D)


# ----------------------------------------------------------------------------
# Kernel 3: PositionEmbeddingSine (normalize=True, scale=2*pi, T=10000)
# Coordinates generated in-kernel (iota); single sin() with +pi/2 phase for cos.
# ----------------------------------------------------------------------------
def _pos_sine_kernel(inv_ref, ph_ref, o_ref, *, th, y_scale, x_scale):
    i = pl.program_id(0)
    shp = o_ref.shape[1:]                                  # (th, W, npf)
    base = (i * th).astype(jnp.float32)
    row = jax.lax.broadcasted_iota(jnp.int32, shp, 0).astype(jnp.float32) + (base + 1.0)
    col = jax.lax.broadcasted_iota(jnp.int32, shp, 1).astype(jnp.float32) + 1.0
    inv = inv_ref[...]
    ph = ph_ref[...]
    o_ref[0] = jnp.sin(row * y_scale * inv + ph)           # y-channels
    o_ref[1] = jnp.sin(col * x_scale * inv + ph)           # x-channels


def position_encoding_sine(H, W, d_model, temperature=10000.0,
                           scale=2.0 * math.pi, eps=1e-6):
    """Returns (1, d_model, H, W) f32 master (batch broadcast done by caller)."""
    assert d_model % 2 == 0
    npf = d_model // 2
    j = jnp.arange(npf)
    dim_t = temperature ** (2.0 * (j // 2).astype(jnp.float32) / npf)
    inv = (1.0 / dim_t).reshape(1, 1, npf).astype(jnp.float32)
    phase = ((j % 2).astype(jnp.float32) * (math.pi / 2.0)).reshape(1, 1, npf)

    max_rows = max(1, (2 * 1024 * 1024) // max(1, W * npf * 4 * 2))
    th = H if H <= max_rows else max(d for d in range(1, max_rows + 1) if H % d == 0)
    y_scale = scale / (H + eps)
    x_scale = scale / (W + eps)

    out = pl.pallas_call(
        functools.partial(_pos_sine_kernel, th=th, y_scale=y_scale, x_scale=x_scale),
        out_shape=jax.ShapeDtypeStruct((2, H, W, npf), jnp.float32),
        grid=(H // th,),
        in_specs=[
            pl.BlockSpec((1, 1, npf), lambda i: (0, 0, 0)),
            pl.BlockSpec((1, 1, npf), lambda i: (0, 0, 0)),
        ],
        out_specs=pl.BlockSpec((2, th, W, npf), lambda i: (0, i, 0, 0)),
        compiler_params=pltpu.CompilerParams(
            dimension_semantics=("parallel",),
            vmem_limit_bytes=_vmem_limit(4 * (2 * th * W * npf * 4)),
        ),
    )(inv, phase)

    # (part, H, W, npf) -> (1, part*npf + j, H, W): y-channels then x-channels.
    return jnp.transpose(out, (0, 3, 1, 2)).reshape(1, d_model, H, W)


# ----------------------------------------------------------------------------
# FpnNeck (Pallas)
# ----------------------------------------------------------------------------
class FpnNeckPallas:
    """Pallas/TPU implementation of sam2 FpnNeck.forward
    (kernel_size=1, stride=1, padding=0, fpn_interp_model='bilinear')."""

    def __init__(self, d_model, backbone_channel_list, fuse_type="sum",
                 fpn_top_down_levels=None, key=None):
        assert fuse_type in ("sum", "avg")
        if key is None:
            key = jax.random.PRNGKey(0)
        self.d_model = d_model
        self.backbone_channel_list = list(backbone_channel_list)
        self.fuse_type = fuse_type
        n_levels = len(self.backbone_channel_list)
        if fpn_top_down_levels is None:
            fpn_top_down_levels = range(n_levels)
        self.fpn_top_down_levels = list(fpn_top_down_levels)

        # 1x1 conv params: convs[k] maps backbone_channel_list[k] -> d_model.
        # f32 masters (for the reference check) + bf16 copies that feed the MXU.
        self.weights, self.biases, self.weights_bf16 = [], [], []
        for cin in self.backbone_channel_list:
            key, kw, kb = jax.random.split(key, 3)
            bound = 1.0 / math.sqrt(cin)
            w = jax.random.uniform(kw, (cin, d_model), jnp.float32, -bound, bound)
            b = jax.random.uniform(kb, (d_model,), jnp.float32, -bound, bound)
            self.weights.append(w)
            self.biases.append(b)
            self.weights_bf16.append(w.astype(jnp.bfloat16))

        self._conv = jax.jit(conv1x1)
        self._fuse = jax.jit(functools.partial(topdown_fuse, avg=(fuse_type == "avg")))
        self._to_nchw_f32 = jax.jit(
            lambda a: jnp.transpose(a, (0, 3, 1, 2)).astype(jnp.float32))

        # pos encoding is input-independent: cache both the (1,C,H,W) master and
        # the broadcast/cast (B,C,H,W) tensor.
        self._pos_master_cache = {}
        self._pos_bcast_cache = {}

    def _pos(self, B, H, W, dtype):
        key = (B, H, W, str(jnp.dtype(dtype)))
        if key not in self._pos_bcast_cache:
            master = self._pos_master_cache.get((H, W))
            if master is None:
                master = position_encoding_sine(H, W, self.d_model)
                self._pos_master_cache[(H, W)] = master
            self._pos_bcast_cache[key] = jnp.broadcast_to(
                master, (B, self.d_model, H, W)).astype(dtype)
        return self._pos_bcast_cache[key]

    def __call__(self, xs):
        # xs[i] is NCHW with channels backbone_channel_list[n - i] (xs[-1] lowest res).
        n = len(xs) - 1
        assert len(xs) == len(self.backbone_channel_list)
        out = [None] * (n + 1)
        pos = [None] * (n + 1)
        prev = None                                    # running top-down carry (NHWC bf16)
        for i in range(n, -1, -1):
            lateral = self._conv(xs[i], self.weights_bf16[n - i], self.biases[n - i])
            if (i in self.fpn_top_down_levels) and (prev is not None):
                prev = self._fuse(prev, lateral)
            else:
                prev = lateral
            out[i] = self._to_nchw_f32(prev)           # NCHW f32 (PyTorch convention)
            B, H, W, _ = lateral.shape
            pos[i] = self._pos(B, H, W, out[i].dtype)
        # TODO(synk): sam2.debug_utils capture_debug_state hooks are logging-only; omitted.
        return out, pos


# ----------------------------------------------------------------------------
# Plain-JAX reference (f32, HIGHEST precision) for a lightweight self-check
# ----------------------------------------------------------------------------
def _up2_axis_ref(x, axis):
    N = x.shape[axis]
    o = jnp.arange(2 * N, dtype=jnp.float32)
    src = jnp.clip((o + 0.5) * 0.5 - 0.5, 0.0, N - 1.0)
    i0 = jnp.floor(src).astype(jnp.int32)
    i1 = jnp.minimum(i0 + 1, N - 1)
    w1 = src - i0.astype(jnp.float32)
    w0 = 1.0 - w1
    shape = [1] * x.ndim
    shape[axis] = 2 * N
    return (jnp.take(x, i0, axis=axis) * w0.reshape(shape)
            + jnp.take(x, i1, axis=axis) * w1.reshape(shape))


def _ref_pos(B, H, W, d_model, temperature=10000.0, scale=2.0 * math.pi, eps=1e-6):
    npf = d_model // 2
    y = jnp.broadcast_to(
        (jnp.arange(1, H + 1, dtype=jnp.float32) / (H + eps) * scale)[:, None], (H, W))
    x = jnp.broadcast_to(
        (jnp.arange(1, W + 1, dtype=jnp.float32) / (W + eps) * scale)[None, :], (H, W))
    j = jnp.arange(npf)
    dim_t = temperature ** (2.0 * (j // 2).astype(jnp.float32) / npf)
    py = y[:, :, None] / dim_t
    px = x[:, :, None] / dim_t
    py = jnp.where(j % 2 == 0, jnp.sin(py), jnp.cos(py))
    px = jnp.where(j % 2 == 0, jnp.sin(px), jnp.cos(px))
    p = jnp.concatenate([py, px], axis=-1)
    return jnp.broadcast_to(jnp.transpose(p, (2, 0, 1))[None], (B, d_model, H, W))


def _ref_forward(xs, neck):
    n = len(xs) - 1
    out = [None] * (n + 1)
    pos = [None] * (n + 1)
    prev = None
    for i in range(n, -1, -1):
        x = jnp.transpose(xs[i], (0, 2, 3, 1)).astype(jnp.float32)
        w, b = neck.weights[n - i], neck.biases[n - i]
        lat = jnp.einsum("bhwc,cd->bhwd", x, w,
                         precision=jax.lax.Precision.HIGHEST) + b
        if (i in neck.fpn_top_down_levels) and (prev is not None):
            up = _up2_axis_ref(_up2_axis_ref(prev, axis=1), axis=2)
            prev = lat + up
            if neck.fuse_type == "avg":
                prev = prev / 2.0
        else:
            prev = lat
        out[i] = jnp.transpose(prev, (0, 3, 1, 2))
        B, H, W, _ = lat.shape
        pos[i] = _ref_pos(B, H, W, neck.d_model)
    return out, pos


if __name__ == "__main__":
    B = 2
    d_model = 32
    # backbone_channel_list ordered low-res-first (as in SAM2 configs):
    # convs[0] (96->32) applies to xs[-1] (lowest res), convs[2] (48->32) to xs[0].
    backbone_channel_list = [96, 64, 48]
    shapes = [(B, 48, 16, 16), (B, 64, 8, 8), (B, 96, 4, 4)]

    key = jax.random.PRNGKey(0)
    keys = jax.random.split(key, len(shapes))
    xs = [jax.random.normal(k, s, jnp.float32) for k, s in zip(keys, shapes)]

    neck = FpnNeckPallas(d_model, backbone_channel_list,
                         fuse_type="sum", key=jax.random.PRNGKey(42))

    out, pos = neck(xs)
    jax.block_until_ready((out, pos))

    # Self-check vs the plain-JAX f32 reference (Pallas path runs bf16 operands /
    # bf16 carry with f32 accumulation -> tolerance covers the bf16 quantization).
    out_ref, pos_ref = _ref_forward(xs, neck)
    ok = True
    for o, orf in zip(out, out_ref):
        ok &= bool(jnp.allclose(o, orf, atol=3e-2, rtol=3e-2))
    for p, prf in zip(pos, pos_ref):
        ok &= bool(jnp.allclose(p, prf, atol=5e-4, rtol=5e-4))
    assert ok, "Pallas FpnNeck output mismatch vs reference"

    print("KERNEL_OK")
</pallas_src>

<mosaic_0001>
module attributes {stable_mosaic.version = 11 : i64} {
  func.func @_conv1x1_kernel(%arg0: i32, %arg1: memref<32x96xbf16, #tpu.memory_space<vmem>>, %arg2: memref<96x32xbf16, #tpu.memory_space<vmem>>, %arg3: memref<1x32xf32, #tpu.memory_space<vmem>>, %arg4: memref<32x32xbf16, #tpu.memory_space<vmem>>) attributes {dimension_semantics = [#tpu.dimension_semantics<parallel>], iteration_bounds = array<i64: 1>, scalar_prefetch = 0 : i64, scratch_operands = 0 : i64, tpu.core_type = #tpu.core_type<tc>, window_params = [{transform_indices = @transform_0, window_bounds = array<i64: 32, 96>}, {pipeline_mode = #tpu.pipeline_mode<synchronous>, transform_indices = @transform_1, window_bounds = array<i64: 96, 32>}, {pipeline_mode = #tpu.pipeline_mode<synchronous>, transform_indices = @transform_2, window_bounds = array<i64: 1, 32>}, {transform_indices = @transform_3, window_bounds = array<i64: 32, 32>}]} {
    %c0 = arith.constant 0 : index
    %c0_0 = arith.constant 0 : index
    %0 = vector.load %arg1[%c0, %c0_0] : memref<32x96xbf16, #tpu.memory_space<vmem>>, vector<32x96xbf16>
    %c0_1 = arith.constant 0 : index
    %c0_2 = arith.constant 0 : index
    %1 = vector.load %arg2[%c0_1, %c0_2] : memref<96x32xbf16, #tpu.memory_space<vmem>>, vector<96x32xbf16>
    %cst = arith.constant dense<0.000000e+00> : vector<32x32xf32>
    %2 = tpu.matmul %0, %1, %cst {dimension_numbers = #tpu.dot_dimension_numbers<[1], [0], [0], [1], [0, 0, 1, 1], [], []>} : vector<32x96xbf16>, vector<96x32xbf16>, vector<32x32xf32> -> vector<32x32xf32>
    %c0_3 = arith.constant 0 : index
    %c0_4 = arith.constant 0 : index
    %3 = vector.load %arg3[%c0_3, %c0_4] : memref<1x32xf32, #tpu.memory_space<vmem>>, vector<1x32xf32>
    %4 = vector.broadcast %3 : vector<1x32xf32> to vector<32x32xf32>
    %5 = arith.addf %2, %4 : vector<32x32xf32>
    %6 = arith.truncf %5 : vector<32x32xf32> to vector<32x32xbf16>
    %c0_5 = arith.constant 0 : index
    %c0_6 = arith.constant 0 : index
    %7 = vector.load %arg4[%c0_5, %c0_6] : memref<32x32xbf16, #tpu.memory_space<vmem>>, vector<32x32xbf16>
    tpu.vector_store %arg4[%c0_5, %c0_6], %6 {strides = array<i32>} : memref<32x32xbf16, #tpu.memory_space<vmem>>, vector<32x32xbf16>,
    return
  }
  func.func @transform_0(%arg0: i32) -> (i32, i32) {
    %c0_i32 = arith.constant 0 : i32
    %c0_i32_0 = arith.constant 0 : i32
    return %arg0, %c0_i32 : i32, i32
  }
  func.func @transform_1(%arg0: i32) -> (i32, i32) {
    %c0_i32 = arith.constant 0 : i32
    %c0_i32_0 = arith.constant 0 : i32
    %c0_i32_1 = arith.constant 0 : i32
    return %c0_i32, %c0_i32_0 : i32, i32
  }
  func.func @transform_2(%arg0: i32) -> (i32, i32) {
    %c0_i32 = arith.constant 0 : i32
    %c0_i32_0 = arith.constant 0 : i32
    %c0_i32_1 = arith.constant 0 : i32
    return %c0_i32, %c0_i32_0 : i32, i32
  }
  func.func @transform_3(%arg0: i32) -> (i32, i32) {
    %c0_i32 = arith.constant 0 : i32
    %c0_i32_0 = arith.constant 0 : i32
    return %arg0, %c0_i32 : i32, i32
  }
}

</mosaic_0001>

<bundles_post_ra>
// kernel: conv1x1.1
= control target key start
LH: loop header
LB: loop body
LE: loop exit
PB: predicated region body
PF: predicated region fallthrough
CT: control target
= control target key end

     0   :  { %vm85_vm0 = vcmask 785408   ;;  %s313_s0 = inlined_call_operand.vmem [shape: bf16[32,96], index: 0, kind: input, shape index: {}]   ;;  %s314_s1 = inlined_call_operand.vmem [shape: bf16[96,32], index: 1, kind: input, shape index: {}]   ;;  %s315_s2 = inlined_call_operand.vmem [shape: f32[1,32], index: 2, kind: input, shape index: {}]   ;;  %s316_s3 = inlined_call_operand.hbm [shape: bf16[32,32], index: 3, kind: output, shape index: {}]  }
   0x1   :  { %v224_v0 = vld [vmem:[%s314_s1 + $0x28] sm:$0xff]   ;;  %v225_v1 = vld [vmem:[%s314_s1 + $0x20] sm:$0xff]   ;;  %v226_v2 = vld [vmem:[%s314_s1 + $0x18] sm:$0xff]  }
   0x2   :  { %205 = vmatprep.subr.bf16.mxu0 %v224_v0  ;;  %v230_v3 = vld [vmem:[%s313_s0] sm:$0xff]   ;;  %v227_v4 = vld [vmem:[%s314_s1 + $0x10] sm:$0xff]  }
   0x3   :  { %206 = vmatpush3.bf16.msra.mxu0 %v224_v0  ;;  %217 = vmatprep.mubr.msk.bf16.mxu0 %vm85_vm0, %v230_v3 }
   0x4   :  { %207 = vmatprep.subr.bf16.mxu0 %v225_v1 }
   0x7   :  { %208 = vmatpush3.bf16.msra.mxu0 %v225_v1 }
   0x8   :  { %209 = vmatprep.subr.bf16.mxu0 %v226_v2 }
   0x9   :  { %8 = vsyncpa [#allocation3], 0  ;;  %v228_v5 = vld [vmem:[%s314_s1 + $0x8] sm:$0xff]   ;;  %v229_v6 = vld [vmem:[%s314_s1] sm:$0xff]   ;;  %vm157_vm1 = vcmask 257024   ;;  %s254_s1 = smov [#allocation2]  }
   0xa   :  { %v231_v7 = vld [vmem:[%s313_s0 + $0x8] sm:$0xff]   ;;  %v178_v8 = vld [vmem:[%s315_s2] ss:$0 sm:$0xff]  ;;  %s167_s0 = sshll.u32 %s254_s1, 4  ;;  %s168_s0 = int_to_ptr.vmem [resolvable:$true] %s167_s0 }
   0xb   :  { %210 = vmatpush3.bf16.msra.mxu0 %v226_v2  ;;  %s232_s2 = scalar_lea.vmem %s168_s0, 256  ;;  %p237_p1 = scmp.lt.s32.totalorder %s168_s0, %s168_s0 }
   0xc   :  { %211 = vmatprep.subr.bf16.mxu0 %v227_v4  ;;  %p233_p0 = scmp.ne.s32.totalorder %s168_s0, %s232_s2  ;;  %p238_p2 = scmp.lt.s32.totalorder %s232_s2, %s232_s2 }
   0xe   :  { %p239_p3 = por %p238_p2, %p237_p1 }
   0xf   :  { %212 = vmatpush3.bf16.msra.mxu0 %v227_v4 }
  0x10   :  { %213 = vmatprep.subr.bf16.mxu0 %v228_v5  ;;  %p240_p4 = pnand %p239_p3, %p233_p0 }
  0x13   :  { %214 = vmatpush3.bf16.msra.mxu0 %v228_v5 }
  0x14   :  { %215 = vmatprep.subr.bf16.mxu0 %v229_v6 }
  0x17   :  { %216 = vmatpush3.bf16.msra.mxu0 %v229_v6 }
  0x1a   :  { %218 = vmatmul.mubr.msk.bf16.vlgmr.msra.gmra.mxu0 %vm85_vm0, %v231_v7 }
  0xda   :  { %v219_v9 = vpop.f32.mrf.mxu0 }
  0xdb   :  { %v135_v10 = vadd.f32 %v219_v9, %v178_v8 }
  0xdc   :  { %v126_v11 = vpop.f32.mrf.mxu0 }
  0xdd   :  { %v195_v12 = vpack.c.bf16 %v135_v10, %v135_v10  ;;  %v127_v13 = vadd.f32 %v178_v8, %v126_v11 }
  0xde   :  { %v220_v14 = vpop.f32.mrf.mxu0 }
  0xdf   :  { %160 = vst.msk [vmem:[#allocation2 + $0x8] sm:$0xf] %vm157_vm1, %v195_v12  ;;  %v193_v15 = vpack.c.bf16 %v127_v13, %v127_v13  ;;  %v138_v16 = vadd.f32 %v220_v14, %v178_v8 }
  0xe0   :  { %v129_v17 = vpop.f32.mrf.mxu0 }
  0xe1   :  { %158 = vst.msk [vmem:[#allocation2] sm:$0xf] %vm157_vm1, %v193_v15  ;;  %v196_v18 = vpack.c.bf16 %v138_v16, %v138_v16  ;;  %v130_v19 = vadd.f32 %v178_v8, %v129_v17 }
  0xe3   :  { %161 = vst.msk [vmem:[#allocation2 + $0xc] sm:$0xf] %vm157_vm1, %v196_v18  ;;  %v194_v20 = vpack.c.bf16 %v130_v19, %v130_v19 }
  0xe5   :  { %159 = vst.msk [vmem:[#allocation2 + $0x4] sm:$0xf] %vm157_vm1, %v194_v20 }
  0xe6   :  { %243 = shalt.err (!%p240_p4)
}
  0xe7   :  { %s255_s30 = smov 64   ;;  %s256_s4 = smov 4  }
  0xe8   :  { %173 = dma.vmem_to_hbm [thread:$0]  %s168_s0, 256, %s316_s3, [#allocation3], %s255_s30, %s255_s30, %s256_s4  }
  0xe9   :  { %252 = dma.done.wait [#allocation3], 256  }
  0xea   :  { %253 = vsyncadd [#allocation3], 4294967040 }
  0xeb   :  { %177 = vsyncpa [#allocation3], 1 }

</bundles_post_ra>
